<compile_context>
chip_gen: v7x
topology: tpu7x:2x2x1
jax: 0.10.0
libtpu: 0.0.40
codegen_flags: <defaults>
</compile_context>

<pallas_src>
import functools

import jax
import jax.numpy as jnp
from jax import lax
from jax.experimental import pallas as pl
from jax.experimental.pallas import tpu as pltpu


# ---------------------------------------------------------------------------
# Generation-aware budgets
# ---------------------------------------------------------------------------
def _budgets():
    """Returns (vmem_limit_bytes, max_block_bytes) tuned per TPU generation."""
    try:
        vmem_cap = int(pltpu.get_tpu_info().vmem_capacity_bytes)
    except Exception:
        vmem_cap = 64 * 1024 * 1024          # conservative (v7x-sized) fallback
    if vmem_cap >= 100 * 1024 * 1024:        # v5e / v6e: 128 MiB physical
        return 96 * 1024 * 1024, 8 * 1024 * 1024
    else:                                     # v7x: 64 MiB physical
        return 48 * 1024 * 1024, 4 * 1024 * 1024


def _spatial_tile(hw, c, itemsize, max_block_bytes):
    """Lane-dense spatial tile keeping one (1, C, tile) block under a VMEM budget."""
    max_lanes = max(128, max_block_bytes // max(1, c * itemsize))
    if hw <= max_lanes:
        return hw                      # whole (flattened) image fits in one tile
    best = 0
    t = 128
    while t <= max_lanes:
        if hw % t == 0:
            best = t
        t += 128
    if best:
        return best                    # 128-aligned divisor of H*W
    return (max_lanes // 128) * 128    # ragged last tile; kernel masks it


# ---------------------------------------------------------------------------
# Fused single-pass kernel: pool -> MLP -> scale, x resident in VMEM
# ---------------------------------------------------------------------------
def se_fused_kernel(x_ref, w1_ref, w2_ref, o_ref, *, inv_hw):
    # x_ref / o_ref: (1, C, hw); w1_ref: (C_hid, C); w2_ref: (C, C_hid)
    x = x_ref[...]
    # Global average pool with f32 accumulation (no full-tile upcast copy).
    pooled = jnp.sum(x, axis=-1, keepdims=True, dtype=jnp.float32)[0] * inv_hw  # (C,1)
    # Excitation MLP in column form: channel axis stays on sublanes, no transposes.
    h = jnp.maximum(
        jnp.dot(w1_ref[...].astype(jnp.float32), pooled,
                preferred_element_type=jnp.float32), 0.0)                        # (C_hid,1)
    s = jax.nn.sigmoid(
        jnp.dot(w2_ref[...].astype(jnp.float32), h,
                preferred_element_type=jnp.float32))                             # (C,1)
    o_ref[...] = (x * s[None].astype(x.dtype)).astype(o_ref.dtype)


# ---------------------------------------------------------------------------
# Two-pass fallback kernels
# ---------------------------------------------------------------------------
def se_pool_kernel(x_ref, sum_ref, *, hw, s_tile):
    # x_ref: (1, C, s_tile); sum_ref: (1, C, 1) f32, resident across the
    # spatial ("arbitrary") axis as the accumulator.
    t = pl.program_id(1)

    @pl.when(t == 0)
    def _():
        sum_ref[...] = jnp.zeros_like(sum_ref)

    if hw % s_tile != 0:
        # Only the last tile is ragged: gate the mask so full tiles stay a
        # pure load + reduce loop.
        last = pl.num_programs(1) - 1

        @pl.when(t != last)
        def _():
            sum_ref[...] += jnp.sum(x_ref[...], axis=-1, keepdims=True,
                                    dtype=jnp.float32)

        @pl.when(t == last)
        def _():
            x = x_ref[...]
            lane = lax.broadcasted_iota(jnp.int32, x.shape, dimension=2)
            x = jnp.where(t * s_tile + lane < hw, x, jnp.zeros_like(x))
            sum_ref[...] += jnp.sum(x, axis=-1, keepdims=True, dtype=jnp.float32)
    else:
        sum_ref[...] += jnp.sum(x_ref[...], axis=-1, keepdims=True,
                                dtype=jnp.float32)


def se_scale_kernel(x_ref, s_ref, o_ref):
    # x_ref / o_ref: (1, C, s_tile); s_ref: (1, C, 1) float32.
    # NOTE: for a ragged last tile, out-of-range lanes are padded input values
    # scaled and written back; Pallas drops the out-of-bounds portion of the
    # store, so this is safe (implicit contract, same as before).
    scale = s_ref[...].astype(x_ref.dtype)          # cast once, lane-broadcast
    o_ref[...] = (x_ref[...] * scale).astype(o_ref.dtype)


# ---------------------------------------------------------------------------
# Wrapper
# ---------------------------------------------------------------------------
def se_block(x, w1, w2, *, force_two_pass=False):
    """x: (B, C, H, W); w1: (C_hid, C); w2: (C, C_hid). Returns (B, C, H, W)."""
    B, C, H, W = x.shape
    C_hid, C_in = w1.shape
    assert C_in == C and w2.shape == (C, C_hid)

    hw = H * W
    x3 = x.reshape(B, C, hw)                        # free metadata reshape in HBM
    vmem_limit, max_block_bytes = _budgets()

    slab_bytes = C * hw * x.dtype.itemsize
    w_bytes = w1.size * w1.dtype.itemsize + w2.size * w2.dtype.itemsize
    # in + out slabs, each double-buffered, plus double-buffered weights + headroom.
    fused_working = 4 * slab_bytes + 4 * w_bytes + (4 << 20)

    if not force_two_pass and fused_working <= vmem_limit:
        # ---- Fused single pass: one HBM read of x, one write of y. ----
        y3 = pl.pallas_call(
            functools.partial(se_fused_kernel, inv_hw=1.0 / hw),
            out_shape=jax.ShapeDtypeStruct((B, C, hw), x.dtype),
            grid_spec=pltpu.PrefetchScalarGridSpec(
                num_scalar_prefetch=0,
                grid=(B,),
                in_specs=[
                    pl.BlockSpec((1, C, hw), lambda b: (b, 0, 0)),
                    pl.BlockSpec((C_hid, C), lambda b: (0, 0)),
                    pl.BlockSpec((C, C_hid), lambda b: (0, 0)),
                ],
                out_specs=pl.BlockSpec((1, C, hw), lambda b: (b, 0, 0)),
            ),
            compiler_params=pltpu.CompilerParams(
                dimension_semantics=("parallel",),
                vmem_limit_bytes=vmem_limit),
        )(x3, w1, w2)
        return y3.reshape(B, C, H, W)

    # ---- Two-pass fallback for slabs that do not fit VMEM. ----
    s_tile = _spatial_tile(hw, C, x.dtype.itemsize, max_block_bytes)
    n_tiles = pl.cdiv(hw, s_tile)

    # Pass 1: per-(batch, channel) spatial sums only (f32 accumulator).
    sums = pl.pallas_call(
        functools.partial(se_pool_kernel, hw=hw, s_tile=s_tile),
        out_shape=jax.ShapeDtypeStruct((B, C, 1), jnp.float32),
        grid_spec=pltpu.PrefetchScalarGridSpec(
            num_scalar_prefetch=0,
            grid=(B, n_tiles),
            in_specs=[pl.BlockSpec((1, C, s_tile), lambda b, t: (b, 0, t))],
            out_specs=pl.BlockSpec((1, C, 1), lambda b, t: (b, 0, 0)),
        ),
        compiler_params=pltpu.CompilerParams(
            dimension_semantics=("parallel", "arbitrary"),
            vmem_limit_bytes=vmem_limit),
    )(x3)

    # Excitation MLP for all batches at once (real GEMM, plain XLA; tiny traffic).
    pooled = sums[..., 0] * (1.0 / hw)                          # (B, C) f32
    h = jnp.maximum(pooled @ w1.T.astype(jnp.float32), 0.0)     # (B, C_hid)
    s = jax.nn.sigmoid(h @ w2.T.astype(jnp.float32))            # (B, C)
    s = s[..., None]                                            # (B, C, 1) f32

    # Pass 2: streaming channel-wise rescale with a lane-dense output.
    y3 = pl.pallas_call(
        se_scale_kernel,
        out_shape=jax.ShapeDtypeStruct((B, C, hw), x.dtype),
        grid_spec=pltpu.PrefetchScalarGridSpec(
            num_scalar_prefetch=0,
            grid=(B, n_tiles),
            in_specs=[
                pl.BlockSpec((1, C, s_tile), lambda b, t: (b, 0, t)),
                pl.BlockSpec((1, C, 1), lambda b, t: (b, 0, 0)),
            ],
            out_specs=pl.BlockSpec((1, C, s_tile), lambda b, t: (b, 0, t)),
        ),
        compiler_params=pltpu.CompilerParams(
            dimension_semantics=("parallel", "parallel"),
            vmem_limit_bytes=vmem_limit),
    )(x3, s)

    return y3.reshape(B, C, H, W)


def se_block_reference(x, w1, w2):
    pooled = jnp.mean(x.astype(jnp.float32), axis=(2, 3))
    h = jnp.maximum(pooled @ w1.T, 0.0)
    s = jax.nn.sigmoid(h @ w2.T)
    return (x * s[:, :, None, None].astype(x.dtype)).astype(x.dtype)


if __name__ == "__main__":
    # Small shapes consistent with the module: batch=2, channels=4, spatial=16
    B, C, H, W = 2, 4, 16, 16
    reduction = 1
    C_hid = C // reduction  # reduction=1 -> hidden == C

    key = jax.random.PRNGKey(0)
    kx, k1, k2 = jax.random.split(key, 3)

    x = jax.random.normal(kx, (B, C, H, W), dtype=jnp.float32)
    # PyTorch Linear weight shapes: (out_features, in_features), no bias.
    w1 = jax.random.normal(k1, (C_hid, C), dtype=jnp.float32) * 0.5
    w2 = jax.random.normal(k2, (C, C_hid), dtype=jnp.float32) * 0.5

    ref = se_block_reference(x, w1, w2)

    # Primary fused path (slab fits VMEM at these shapes).
    out = jax.block_until_ready(se_block(x, w1, w2))
    assert out.shape == (B, C, H, W)
    assert jnp.allclose(out, ref, atol=1e-5, rtol=1e-5)

    # Two-pass fallback path (exercised explicitly so it stays correct).
    out2 = jax.block_until_ready(se_block(x, w1, w2, force_two_pass=True))
    assert jnp.allclose(out2, ref, atol=1e-5, rtol=1e-5)

    print("KERNEL_OK")
</pallas_src>

<mosaic_0001>
module attributes {stable_mosaic.version = 11 : i64} {
  func.func @se_fused_kernel(%arg0: i32, %arg1: memref<1x4x256xf32, #tpu.memory_space<vmem>>, %arg2: memref<4x4xf32, #tpu.memory_space<vmem>>, %arg3: memref<4x4xf32, #tpu.memory_space<vmem>>, %arg4: memref<1x4x256xf32, #tpu.memory_space<vmem>>) attributes {dimension_semantics = [#tpu.dimension_semantics<parallel>], iteration_bounds = array<i64: 2>, scalar_prefetch = 0 : i64, scratch_operands = 0 : i64, tpu.core_type = #tpu.core_type<tc>, window_params = [{transform_indices = @transform_0, window_bounds = array<i64: 1, 4, 256>}, {pipeline_mode = #tpu.pipeline_mode<synchronous>, transform_indices = @transform_1, window_bounds = array<i64: 4, 4>}, {pipeline_mode = #tpu.pipeline_mode<synchronous>, transform_indices = @transform_2, window_bounds = array<i64: 4, 4>}, {transform_indices = @transform_3, window_bounds = array<i64: 1, 4, 256>}]} {
    %c0 = arith.constant 0 : index
    %c0_0 = arith.constant 0 : index
    %c0_1 = arith.constant 0 : index
    %0 = vector.load %arg1[%c0, %c0_0, %c0_1] : memref<1x4x256xf32, #tpu.memory_space<vmem>>, vector<1x4x256xf32>
    %cst = arith.constant dense<0.000000e+00> : vector<1x4xf32>
    %1 = vector.multi_reduction <add>, %0, %cst [2] : vector<1x4x256xf32> to vector<1x4xf32>
    %2 = vector.shape_cast %1 : vector<1x4xf32> to vector<1x4x1xf32>
    %3 = vector.shape_cast %2 : vector<1x4x1xf32> to vector<4x1xf32>
    %cst_2 = arith.constant 3.906250e-03 : f32
    %4 = vector.broadcast %cst_2 : f32 to vector<4x1xf32>
    %5 = arith.mulf %3, %4 : vector<4x1xf32>
    %c0_3 = arith.constant 0 : index
    %c0_4 = arith.constant 0 : index
    %6 = vector.load %arg2[%c0_3, %c0_4] : memref<4x4xf32, #tpu.memory_space<vmem>>, vector<4x4xf32>
    %cst_5 = arith.constant dense<0.000000e+00> : vector<4x1xf32>
    %7 = tpu.matmul %6, %5, %cst_5 {dimension_numbers = #tpu.dot_dimension_numbers<[1], [0], [0], [1], [0, 0, 1, 1], [], []>} : vector<4x4xf32>, vector<4x1xf32>, vector<4x1xf32> -> vector<4x1xf32>
    %cst_6 = arith.constant 0.000000e+00 : f32
    %8 = vector.broadcast %cst_6 : f32 to vector<4x1xf32>
    %9 = arith.maximumf %7, %8 : vector<4x1xf32>
    %c0_7 = arith.constant 0 : index
    %c0_8 = arith.constant 0 : index
    %10 = vector.load %arg3[%c0_7, %c0_8] : memref<4x4xf32, #tpu.memory_space<vmem>>, vector<4x4xf32>
    %cst_9 = arith.constant dense<0.000000e+00> : vector<4x1xf32>
    %11 = tpu.matmul %10, %9, %cst_9 {dimension_numbers = #tpu.dot_dimension_numbers<[1], [0], [0], [1], [0, 0, 1, 1], [], []>} : vector<4x4xf32>, vector<4x1xf32>, vector<4x1xf32> -> vector<4x1xf32>
    %12 = arith.negf %11 : vector<4x1xf32>
    %13 = math.exp %12 : vector<4x1xf32>
    %cst_10 = arith.constant 1.000000e+00 : f32
    %14 = vector.broadcast %cst_10 : f32 to vector<4x1xf32>
    %15 = arith.addf %14, %13 : vector<4x1xf32>
    %16 = arith.divf %14, %15 : vector<4x1xf32>
    %17 = vector.shape_cast %16 : vector<4x1xf32> to vector<1x4x1xf32>
    %18 = vector.broadcast %17 : vector<1x4x1xf32> to vector<1x4x256xf32>
    %19 = arith.mulf %0, %18 : vector<1x4x256xf32>
    %c0_11 = arith.constant 0 : index
    %c0_12 = arith.constant 0 : index
    %c0_13 = arith.constant 0 : index
    %20 = vector.load %arg4[%c0_11, %c0_12, %c0_13] : memref<1x4x256xf32, #tpu.memory_space<vmem>>, vector<1x4x256xf32>
    tpu.vector_store %arg4[%c0_11, %c0_12, %c0_13], %19 {strides = array<i32>} : memref<1x4x256xf32, #tpu.memory_space<vmem>>, vector<1x4x256xf32>,
    return
  }
  func.func @transform_0(%arg0: i32) -> (i32, i32, i32) {
    %c0_i32 = arith.constant 0 : i32
    %c0_i32_0 = arith.constant 0 : i32
    %c0_i32_1 = arith.constant 0 : i32
    return %arg0, %c0_i32, %c0_i32_0 : i32, i32, i32
  }
  func.func @transform_1(%arg0: i32) -> (i32, i32) {
    %c0_i32 = arith.constant 0 : i32
    %c0_i32_0 = arith.constant 0 : i32
    %c0_i32_1 = arith.constant 0 : i32
    return %c0_i32, %c0_i32_0 : i32, i32
  }
  func.func @transform_2(%arg0: i32) -> (i32, i32) {
    %c0_i32 = arith.constant 0 : i32
    %c0_i32_0 = arith.constant 0 : i32
    %c0_i32_1 = arith.constant 0 : i32
    return %c0_i32, %c0_i32_0 : i32, i32
  }
  func.func @transform_3(%arg0: i32) -> (i32, i32, i32) {
    %c0_i32 = arith.constant 0 : i32
    %c0_i32_0 = arith.constant 0 : i32
    %c0_i32_1 = arith.constant 0 : i32
    return %arg0, %c0_i32, %c0_i32_0 : i32, i32, i32
  }
}

</mosaic_0001>

<bundles_post_ra>
// kernel: tpu_custom_call.1
= control target key start
LH: loop header
LB: loop body
LE: loop exit
PB: predicated region body
PF: predicated region fallthrough
CT: control target
= control target key end

     0   :  { %8 = vsyncpa [#allocation3], 0  ;;  %s955_s0 = inlined_call_operand.hbm [shape: f32[2,4,256], index: 0, kind: input, shape index: {}]   ;;  %s956_s1 = inlined_call_operand.hbm [shape: f32[4,4], index: 1, kind: input, shape index: {}]   ;;  %s957_s2 = inlined_call_operand.vmem [shape: f32[4,4], index: 2, kind: input, shape index: {}]   ;;  %s958_s3 = inlined_call_operand.hbm [shape: f32[2,4,256], index: 3, kind: output, shape index: {}]  }
   0x1   :  { %10 = vsyncpa [#allocation3 + $0x1], 0 }
   0x2   :  { %11 = vsyncpa [#allocation6], 0 }
   0x3   :  { %12 = vsyncpa [#allocation4], 0 }
   0x4   :  { %14 = vsyncpa [#allocation4 + $0x1], 0  ;;  %s743_s12 = smov 0   ;;  %s745_s13 = smov 0  }
   0x5   :  { %s747_s14 = smov 0   ;;  %s749_s15 = smov 0  }
   0x6 LB: > { %s764_s16 = sadd.s32 4294967295, %s714_s15   ;;  %s482_s17 = sadd.s32 4294967294, %s714_s15   ;;  %s714_s15 = sphi %s749_s15, %s982_s15   ;;  %s710_s14 = sphi %s747_s14, %s981_s14   ;;  %s706_s13 = sphi %s745_s13, %s980_s13   ;;  %s702_s12 = sphi %s743_s12, %s979_s12  }
   0x7   : > { %p40_p0 = scmp.ne.s32.totalorder %s706_s13, %s702_s12  ;;  %p959_p1 = scmp.eq.s32.totalorder %s764_s16, 0 }
   0x8   : > { %p112_p3 = scmp.eq.s32.totalorder %s482_s17, 1  ;;  %p483_p5 = scmp.ge.s32.totalorder %s714_s15, 1 }
   0x9   : > { %p773_p4 = por %p959_p1, %p40_p0  ;;  %p119_p7 = scmp.lt.s32.totalorder %s714_s15, 3 }
   0xa   : > { %p778_p6 = por %p112_p3, %p40_p0  ;;  %s716_s21 = smov [#allocation5]  }
   0xb   : > { %s962_s18 = scalar_select %p773_p4, 1, 0 }
   0xc   : > { %s963_s19 = scalar_select %p778_p6, 1, 0 }
   0xd   : > { %p783_p8 = pnand %p483_p5, %p119_p7  ;;  %s132_s22 = sshll.u32 %s716_s21, 4  ;;  %s133_s22 = int_to_ptr.vmem [resolvable:$true] %s132_s22 }
   0xe   : > { %s791_s23 = sadd.s32 1, %s714_s15   ;;  %s27_s27 = sadd.s32 1, %s710_s14 }
   0xf   : > { %s964_s20 = scalar_select %p783_p8, 1, 0 }
  0x10   : > { %p527_p10 = pneg %p783_p8  ;;  %s24_s25 = ssub.s32 %s714_s15, %s791_s23 }
  0x11   : > { %p801_p12 = scmp.eq.s32.totalorder %s24_s25, 0  ;;  %s586_s30 = scalar_lea.hbm %s956_s1, 64 }
  0x12   : > { %p795_p11 = pnand %p527_p10, %p959_p1  ;;  %p587_p0 = scmp.ne.s32.totalorder %s956_s1, %s586_s30 }
  0x13   : > { %s966_s26 = scalar_select %p801_p12, 1, 0 }
  0x14   : > { %p588_p3 = pneg %p795_p11  ;;  %p593_p10 = scmp.lt.u32.totalorder %s586_s30, %s956_s1 }
  0x16   : > { %p589_p5 = pnand %p588_p3, %p587_p0 }
  0x18   : > { %p590_p7 = pneg %p589_p5 }
  0x1a   : > { %p595_p9 = pnand %p593_p10, %p590_p7 }
  0x1c   : > { %598 = shalt.err (!%p595_p9)
}
  0x1d   : > { %s599_s8 = scalar_lea.vmem %s133_s22, 64  ;;  %p607_p6 = scmp.lt.s32.totalorder %s133_s22, %s133_s22 }
  0x1e   : > { %p600_p1 = scmp.ne.s32.totalorder %s133_s22, %s599_s8  ;;  %p608_p4 = scmp.lt.s32.totalorder %s599_s8, %s599_s8 }
  0x20   : > { %p602_p2 = pnand %p600_p1, %p588_p3  ;;  %p609_p8 = por %p608_p4, %p607_p6 }
  0x22   : > { %p603_p13 = pneg %p602_p2 }
  0x24   : > { %p610_p12 = pnand %p609_p8, %p603_p13 }
  0x26   : > { %613 = shalt.err (!%p610_p12)
}
  0x27   : > { %530 = dma.hbm_to_vmem [thread:$0]  (!%p795_p11), %s956_s1, 64, %s133_s22, [#allocation6]  }
  0x28   : > { %p967_p1 = scmp.ne.s32.totalorder %s966_s26, 0  ;;  %p35_p2 = scmp.eq.s32.totalorder %s714_s15, 0 }
  0x29   : > { %p968_p4 = scmp.ne.s32.totalorder %s710_s14, %s706_s13  ;;  %p969_p6 = scmp.eq.s32.totalorder %s764_s16, 1 }
  0x2a   : > { %s827_s11 = scalar_select %p967_p1, %s710_s14, %s27_s27  }
  0x2b   : > { %p835_p8 = por %p969_p6, %p968_p4  ;;  %p540_p9 = scmp.lt.s32.totalorder %s714_s15, 2 }
  0x2c   : > { %s146_s21 = sand.u32 1, %s710_s14   ;;  %p971_p12 = pmov %p968_p4 }
  0x2d   : > { %s486_s24 = sshll.u32 %s146_s21, 3  ;;  %s503_s25 = sshll.u32 %s714_s15, 7 }
  0x2e   : > { %p36_p13 = por %p35_p2, %p971_p12  ;;  %s848_s22 = scalar_lea.hbm %s955_s0, %s503_s25 }
  0x2f   : > { %s150_s26 = scalar_lea.vmem [#allocation2], %s486_s24  ;;  %s147_s4 = scalar_lea.sflag [#allocation3], %s146_s21 }
  0x30   : > { %s158_s27 = sshll.u32 %s150_s26, 4  ;;  %p850_p11 = pnand %p540_p9, %p36_p13  ;;  %s854_s27 = int_to_ptr.vmem [resolvable:$true] %s158_s27 }
  0x31   : > { %s614_s5 = scalar_lea.hbm %s848_s22, 128  ;;  %s619_s8 = scalar_lea.hbm %s955_s0, 256 }
  0x32   : > { %p615_p0 = scmp.ne.s32.totalorder %s848_s22, %s614_s5  ;;  %p616_p3 = pneg %p850_p11 }
  0x33   : > { %p620_p10 = scmp.lt.u32.totalorder %s848_s22, %s955_s0  ;;  %p621_p1 = scmp.lt.u32.totalorder %s619_s8, %s614_s5 }
  0x34   : > { %p617_p5 = pnand %p616_p3, %p615_p0  ;;  %p623_p4 = scmp.lt.u32.totalorder %s614_s5, %s848_s22 }
  0x35   : > { %p622_p2 = por %p621_p1, %p620_p10 }
  0x36   : > { %p618_p7 = pneg %p617_p5 }
  0x37   : > { %p624_p6 = por %p623_p4, %p622_p2 }
  0x39   : > { %p625_p9 = pnand %p624_p6, %p618_p7 }
  0x3b   : > { %628 = shalt.err (!%p625_p9)
}
  0x3c   : > { %s629_s21 = scalar_lea.vmem %s854_s27, 128  ;;  %s717_s24 = smov [#allocation2]  }
  0x3d   : > { %p630_p12 = scmp.ne.s32.totalorder %s854_s27, %s629_s21  ;;  %s634_s25 = sshll.u32 %s717_s24, 4  ;;  %s635_s25 = int_to_ptr.vmem [resolvable:$false] %s634_s25 }
  0x3e   : > { %s636_s28 = scalar_lea.vmem %s635_s25, 256  ;;  %p637_p5 = scmp.lt.s32.totalorder %s854_s27, %s635_s25 }
  0x3f   : > { %p632_p13 = pnand %p630_p12, %p616_p3  ;;  %p638_p10 = scmp.lt.s32.totalorder %s636_s28, %s629_s21 }
  0x41   : > { %p633_p0 = pneg %p632_p13  ;;  %p639_p1 = por %p638_p10, %p637_p5 }
  0x43   : > { %p640_p2 = pnand %p639_p1, %p633_p0 }
  0x45   : > { %643 = shalt.err (!%p640_p2)
}
  0x46   : > { %534 = dma.hbm_to_vmem [thread:$0]  (!%p850_p11), %s848_s22, 128, %s854_s27, %s147_s4  }
  0x47   : > { %p973_p7 = scmp.ne.s32.totalorder %s964_s20, 0 }
  0x48   : > { %s884_s29 = sand.u32 (!%p973_p7), 1, %s706_s13   ;;  %p974_p3 = scmp.ne.s32.totalorder (!%p973_p7), %s962_s18, 0 }
  0x49   : > { %167 = sbr.rel (%p973_p7) target bundleno = 834 (0x342), region = 32  ;;  %s490_s26 = sshll.u32 (!%p973_p7), %s884_s29, 3 }
  0x4a   : > { %s170_s5 = scalar_lea.sflag (!%p973_p7), [#allocation3], %s884_s29  ;;  %s173_s6 = scalar_lea.vmem (!%p973_p7), [#allocation2], %s490_s26 }
  0x50   : > { %689 = dma.done.wait (%p974_p3), %s170_s5, 128  }
  0x51   : > { %691 = vsyncadd (%p974_p3), %s170_s5, 4294967168  ;;  %p975_p11 = scmp.eq.s32.totalorder %s764_s16, 0 }
  0x53   : > { %693 = dma.done.wait (%p975_p11), [#allocation6], 64   ;;  %p976_p4 = pmov %p975_p11 }
  0x54   : > { %vm204_vm0 = vcmask 1043456   ;;  %v200_v0 = vld [vmem:[%s173_s6] sm:$0xff]  ;;  %v718_v5 = vmov 0.0   ;;  %vm719_vm1 = vmmov 0   ;;  %v211_v8 = vld [vmem:[#allocation5] sm:$0xf]  ;;  %v380_v22 = vlaneseq }
  0x55   : > { %695 = vsyncadd (%p976_p4), [#allocation6], 4294967232  ;;  %v202_v1 = vcombine.high %v200_v0, %v200_v0  ;;  %v205_v2 = vsel %vm204_vm0, %v200_v0, 0.0  ;;  %509 = vmatprep.subr.mxu0 %v718_v5  ;;  %514 = vmatprep.subr.mxu1 %v718_v5  ;;  %vm212_vm2 = vcmask 31744   ;;  %v290_v12 = vld [vmem:[%s957_s2] sm:$0xf] }
  0x56   : > { %511 = vmatprep.mubr.msk.f32.mxu0 %vm719_vm1, %v718_v5  ;;  %516 = vmatprep.mubr.msk.f32.mxu1 %vm719_vm1, %v718_v5  ;;  %v720_v13 = vmov 0   ;;  %v721_v20 = vmov 839922192   ;;  %v381_v24 = vshrl.u32 %v380_v22, 7  ;;  %s504_s22 = sshll.u32 %s764_s16, 7  ;;  %s199_s27 = scalar_lea.vmem [#allocation7], %s490_s26 }
  0x57   : > { %v206_v3 = vsel %vm204_vm0, %v202_v1, 0.0  ;;  %580 = vset.pattern.permute.xlu0 %v720_v13  ;;  %v378_v21 = vunpack.c.l.s4 %v721_v20  ;;  %s402_s30 = sshll.u32 %s199_s27, 4  ;;  %s911_s8 = scalar_lea.hbm %s958_s3, %s504_s22  ;;  %s913_s30 = int_to_ptr.vmem [resolvable:$true] %s402_s30 }
  0x58   : > { %v207_v4 = vadd.f32 %v206_v3, %v205_v2  ;;  %s388_s9 = scalar_lea.sflag [#allocation4], %s884_s29  ;;  %s644_s10 = scalar_lea.vmem %s913_s30, 128 }
  0x59   : > { %v379_v23 = vunpack.c.0.s8 %v378_v21  ;;  %p645_p6 = scmp.ne.s32.totalorder %s913_s30, %s644_s10  ;;  %s722_s16 = smov [#allocation7]  }
  0x5a   : > { %208 = vadd.xlane.f32.xlu0 %v207_v4  ;;  %s648_s21 = sshll.u32 %s722_s16, 4  ;;  %s649_s21 = int_to_ptr.vmem [resolvable:$false] %s648_s21 }
  0x5b   : > { %v382_v25 = vsub.s32 %v379_v23, %v381_v24  ;;  %p646_p9 = pnand %p645_p6, %p835_p8  ;;  %s650_s24 = scalar_lea.vmem %s649_s21, 256 }
  0x5c   : > { %p651_p13 = scmp.lt.s32.totalorder %s913_s30, %s649_s21  ;;  %p652_p0 = scmp.lt.s32.totalorder %s650_s24, %s644_s10 }
  0x5d   : > { %p647_p12 = pneg %p646_p9 }
  0x5e   : > { %p653_p5 = por %p652_p0, %p651_p13 }
  0x60   : > { %p654_p10 = pnand %p653_p5, %p647_p12 }
  0xe7   : > { %v209_v6 = vpop.xlane.xlu0 %208 }
  0xe8   : > { %v210_v7 = vmul.f32 0.00390625, %v209_v6 }
  0xea   : > { %510 = vmatpush3.msk.msra.mxu0 %vm204_vm0, %v210_v7 }
  0xeb   : > { %512 = vmatmul.mubr.msk.f32.vlgmr.msra.gmra.mrb[0].mxu0 %vm212_vm2, %v211_v8 }
 0x1be   : > { %v285_v9 = vpop.f32.mrb[0].mxu0 }
 0x1bf   : > { %v289_v10 = vmax.f32 %v285_v9, 0.0  ;;  %v513_v11 = vpop.f32.mrb[1].mxu0 }
 0x1c1   : > { %515 = vmatpush3.msk.msra.mxu1 %vm204_vm0, %v289_v10 }
 0x1c2   : > { %517 = vmatmul.mubr.msk.f32.vlgmr.msra.gmra.mrb[0].mxu1 %vm212_vm2, %v290_v12 }
 0x295   : > { %v363_v14 = vpop.f32.mrb[0].mxu1 }
 0x296   : > { %v497_v15 = vmul.f32 -1.442695, %v363_v14  ;;  %v518_v16 = vpop.f32.mrb[1].mxu1 }
 0x298   : > { %582 = vpow2.f32 %v497_v15 }
 0x2a2   : > { %v583_v17 = vpop.eup %582 }
 0x2a3   : > { %v370_v18 = vadd.f32 1.0, %v583_v17 }
 0x2a5   : > { %584 = vrcp.f32 %v370_v18 }
 0x2af   : > { %v585_v19 = vpop.eup %584 }
 0x2b0   : > { %375 = vperm.xlu0 %580, %v585_v19  }
 0x32f   : > { %v376_v26 = vpop.permute.xlu0 %375 }
 0x330   : > { %v383_v27 = vrot.slane %v376_v26, %v382_v25 }
 0x332   : > { %v385_v28 = vmul.f32 %v383_v27, %v200_v0 }
 0x334   : > { %386 = vst [vmem:[%s199_s27] sm:$0xff] %v385_v28 }
 0x335   : > { %657 = shalt.err (!%p654_p10)
}
 0x336   : > { %s658_s25 = scalar_lea.hbm %s911_s8, 128  ;;  %s662_s26 = scalar_lea.hbm %s958_s3, 256 }
 0x337   : > { %p659_p1 = scmp.ne.s32.totalorder %s911_s8, %s658_s25  ;;  %p663_p3 = scmp.lt.u32.totalorder %s911_s8, %s958_s3 }
 0x338   : > { %p664_p11 = scmp.lt.u32.totalorder %s662_s26, %s658_s25  ;;  %p666_p6 = scmp.lt.u32.totalorder %s658_s25, %s911_s8 }
 0x339   : > { %p660_p2 = pnand %p659_p1, %p835_p8 }
 0x33a   : > { %p665_p4 = por %p664_p11, %p663_p3 }
 0x33b   : > { %p661_p7 = pneg %p660_p2 }
 0x33c   : > { %p667_p9 = por %p666_p6, %p665_p4 }
 0x33e   : > { %p668_p12 = pnand %p667_p9, %p661_p7 }
 0x340   : > { %671 = shalt.err (!%p668_p12)
}
 0x341   : > { %525 = dma.vmem_to_hbm [thread:$0]  (%p835_p8), %s913_s30, 128, %s911_s8, %s388_s9  }
 0x342 PF: > { %s414_s18 = sand.u32 1, %s702_s12   ;;  %p977_p13 = scmp.ne.s32.totalorder %s963_s19, 0 }
 0x343   : > { %p978_p0 = scmp.ge.s32.totalorder %s714_s15, 2  ;;  %s415_s20 = scalar_lea.sflag [#allocation4], %s414_s18 }
 0x345   : > { %p536_p5 = pnand %p978_p0, %p977_p13 }
 0x347   : > { %697 = dma.done.wait (!%p536_p5), %s415_s20, 128  }
 0x348   : > { %699 = vsyncadd (!%p536_p5), %s415_s20, 4294967168  ;;  %p17_p10 = scmp.ge.s32.totalorder %s791_s23, 4   ;;  %s979_s12 = smov %s706_s13 }
 0x349   : > { %s980_s13 = smov %s710_s14  ;;  %s981_s14 = smov %s827_s11 }
 0x34a   : > { %s982_s15 = smov %s791_s23  ;;  %19 = sbr.rel (!%p17_p10) target bundleno = 6 (0x6), region = 81 }
 0x351   :  { %420 = vsyncpa [#allocation3], 1 }
 0x352   :  { %422 = vsyncpa [#allocation3 + $0x1], 1 }
 0x353   :  { %423 = vsyncpa [#allocation6], 1 }
 0x354   :  { %424 = vsyncpa [#allocation4], 1 }
 0x355   :  { %426 = vsyncpa [#allocation4 + $0x1], 1 }

</bundles_post_ra>
